<compile_context>
chip_gen: v7x
topology: tpu7x:2x2x1
jax: 0.10.0
libtpu: 0.0.40
codegen_flags: <defaults>
</compile_context>

<pallas_src>
import jax
import jax.numpy as jnp
from jax.experimental import pallas as pl
from jax.experimental.pallas import tpu as pltpu


_OUT_FEATURES = 3


def _round_up(v, m):
    return -(-v // m) * m


def _sublane(dtype):
    # Minimum sublane multiple for a VMEM tile of this dtype:
    # (8,128) for 4-byte, (16,128) for 2-byte, (32,128) for 1-byte.
    return 8 * (4 // jnp.dtype(dtype).itemsize)


def _fc_kernel(x_ref, w_ref, b_ref, o_ref):
    # One (TM, F) row-tile of x @ resident (F, 3) W^T on the MXU with f32
    # accumulation, bias broadcast-add on the VPU, cast to the output dtype.
    acc = jnp.dot(x_ref[...], w_ref[...], preferred_element_type=jnp.float32)
    o_ref[...] = (acc + b_ref[...]).astype(o_ref.dtype)


def fc_forward(x, weight, bias, hc_out_channels=16, num_capsules=10,
               *, compute_dtype=None, tile_m=4096):
    """Pallas equivalent of FC.forward.

    x:             any shape whose elements flatten to (-1, hc_out_channels*10)
                   (mirrors PyTorch's x.view(-1, self.hc_out_channels * 10))
    weight:        (3, F) PyTorch-layout Linear weight
    bias:          (3,)
    compute_dtype: optional dtype (e.g. jnp.bfloat16) for the streamed x / W^T.
                   If x already has that dtype no cast is emitted; otherwise the
                   cast is allowed to fuse into the pallas_call operand.
                   Accumulation is always f32; output keeps x's dtype.
    tile_m:        row-tile size, multiple of the dtype sublane tile (8 f32,
                   16 bf16, 32 8-bit).  4096 (f32) ~= 12.2 MiB padded/double-
                   buffered; 8192 f32 / 16384 bf16 ~= 24 MiB (good on v7x).
    """
    # The PyTorch module hard-codes *10 in forward(); mirror it but assert the
    # shapes are actually consistent instead of silently mismatching.
    F = hc_out_channels * 10
    assert weight.shape == (_OUT_FEATURES, F), (weight.shape, F)
    assert bias.shape == (_OUT_FEATURES,), bias.shape
    assert x.size % F == 0, (x.shape, F)

    x_flat = x.reshape(-1, F)
    B = x_flat.shape[0]
    out_dtype = x_flat.dtype

    # Streamed dtype for x and W^T.  Skip the cast entirely when x is already
    # stored in compute_dtype; otherwise emit it and rely on allow_input_fusion
    # so it does not become a standalone extra HBM round trip.
    if compute_dtype is not None and x_flat.dtype != jnp.dtype(compute_dtype):
        x_in = x_flat.astype(compute_dtype)
    else:
        x_in = x_flat
    w_t = weight.T.astype(x_in.dtype)                      # (F, 3), tiny
    b2 = bias.reshape(1, _OUT_FEATURES).astype(jnp.float32)

    sub_x = _sublane(x_in.dtype)
    sub_o = _sublane(out_dtype)
    sub = max(sub_x, sub_o)
    assert tile_m % sub == 0, (
        f"tile_m={tile_m} must be a multiple of {sub} for streamed dtype "
        f"{x_in.dtype} / output dtype {out_dtype}")

    # Row-tile size.  Tiny batches use a single full-extent block (block dim ==
    # full array dim is always legal).  Larger batches are split into at least
    # 4 grid steps so the "parallel" axis actually gives v7x's two TensorCores
    # work to share (neutral on single-TC v5e/v6e), capped at tile_m.  Ragged
    # last blocks are handled by Pallas's partial-block masking.
    if B <= 2 * sub:
        TM = B
    else:
        MIN_TILES = 4
        target = _round_up(pl.cdiv(B, MIN_TILES), sub)
        TM = max(sub, min(tile_m, target))
    grid = (pl.cdiv(B, TM),)

    # Padded VMEM footprint (lane dim rounds up to 128, sublane dim to the
    # dtype tile); every block is double-buffered by the Pallas pipeline.
    isz = lambda d: jnp.dtype(d).itemsize
    x_buf = _round_up(TM, sub_x) * _round_up(F, 128) * isz(x_in.dtype)
    w_buf = _round_up(F, _sublane(w_t.dtype)) * 128 * isz(w_t.dtype)
    b_buf = 8 * 128 * 4
    o_buf = _round_up(TM, sub_o) * 128 * isz(out_dtype)
    padded_vmem = 2 * (x_buf + w_buf + b_buf + o_buf)
    # Explicit limit from the padded math + headroom for compiler scratch.
    # (Caller is responsible for keeping this under 64 MiB-physical on v7x.)
    vmem_limit = int(min(100 << 20, padded_vmem + (8 << 20)))

    cost = pl.CostEstimate(
        flops=2 * B * F * _OUT_FEATURES,
        transcendentals=0,
        bytes_accessed=(x_in.size * isz(x_in.dtype)
                        + w_t.size * isz(w_t.dtype)
                        + b2.size * 4
                        + B * _OUT_FEATURES * isz(out_dtype)),
    )

    out = pl.pallas_call(
        _fc_kernel,
        out_shape=jax.ShapeDtypeStruct((B, _OUT_FEATURES), out_dtype),
        grid=grid,
        in_specs=[
            pl.BlockSpec((TM, F), lambda i: (i, 0)),               # streamed rows
            pl.BlockSpec((F, _OUT_FEATURES), lambda i: (0, 0)),    # resident W^T
            pl.BlockSpec((1, _OUT_FEATURES), lambda i: (0, 0)),    # resident bias
        ],
        out_specs=pl.BlockSpec((TM, _OUT_FEATURES), lambda i: (i, 0)),
        compiler_params=pltpu.CompilerParams(
            # Independent row tiles -> v7x can shard them over its two
            # TensorCores; neutral on v5e/v6e.
            dimension_semantics=("parallel",),
            # Budget derived from padded VMEM math above.
            vmem_limit_bytes=vmem_limit,
            # Let an upstream cast (e.g. f32->bf16 of x) fuse into this
            # operand instead of costing an extra HBM round trip.
            allow_input_fusion=[True, False, False],
        ),
        cost_estimate=cost,
    )(x_in, w_t, b2)
    return out


if __name__ == "__main__":
    hc_out_channels = 16
    num_capsules = 10
    in_features = hc_out_channels * 10   # 160
    out_features = 3
    batch = 2

    key = jax.random.PRNGKey(0)
    kx, kw, kb, kx2 = jax.random.split(key, 4)

    # Deterministic parameter init mirroring the PyTorch module:
    #   weight: xavier_normal_  -> std = sqrt(2 / (fan_in + fan_out))
    #   bias:   nn.Linear default uniform(-1/sqrt(fan_in), 1/sqrt(fan_in))
    xavier_std = jnp.sqrt(2.0 / (in_features + out_features))
    weight = xavier_std * jax.random.normal(
        kw, (out_features, in_features), dtype=jnp.float32)
    bound = 1.0 / jnp.sqrt(in_features)
    bias = jax.random.uniform(
        kb, (out_features,), minval=-bound, maxval=bound, dtype=jnp.float32)

    # Input shaped like the capsule output the module consumes:
    # (batch, num_capsules, hc_out_channels) -> flattened to (batch, 160).
    x = jax.random.normal(
        kx, (batch, num_capsules, hc_out_channels), dtype=jnp.float32)

    # 1) f32 path at the module's tiny batch (single full-extent block).
    y = jax.block_until_ready(
        fc_forward(x, weight, bias, hc_out_channels, num_capsules))
    y_ref = x.reshape(-1, in_features) @ weight.T + bias
    assert y.shape == (batch, out_features)
    assert jnp.allclose(y, y_ref, atol=1e-5, rtol=1e-5)

    # 2) multi-tile path: small tile forces grid > 1 with a ragged last block.
    x_big = jax.random.normal(
        kx2, (20, num_capsules, hc_out_channels), dtype=jnp.float32)
    y_big = jax.block_until_ready(
        fc_forward(x_big, weight, bias, hc_out_channels, num_capsules,
                   tile_m=8))
    y_big_ref = x_big.reshape(-1, in_features) @ weight.T + bias
    assert y_big.shape == (20, out_features)
    assert jnp.allclose(y_big, y_big_ref, atol=1e-5, rtol=1e-5)

    # 3) bf16-streamed path (fusable cast, f32 MXU accumulation, f32 output).
    y_bf16 = jax.block_until_ready(
        fc_forward(x_big, weight, bias, hc_out_channels, num_capsules,
                   compute_dtype=jnp.bfloat16, tile_m=16))
    ref_bf16 = (
        x_big.reshape(-1, in_features).astype(jnp.bfloat16).astype(jnp.float32)
        @ weight.T.astype(jnp.bfloat16).astype(jnp.float32) + bias)
    assert y_bf16.dtype == x_big.dtype
    assert jnp.allclose(y_bf16, ref_bf16, atol=5e-2, rtol=5e-2)

    print("KERNEL_OK")
</pallas_src>

<mosaic_0001>
module attributes {stable_mosaic.version = 11 : i64} {
  func.func @_fc_kernel(%arg0: i32, %arg1: memref<2x160xf32, #tpu.memory_space<vmem>>, %arg2: memref<160x3xf32, #tpu.memory_space<vmem>>, %arg3: memref<1x3xf32, #tpu.memory_space<vmem>>, %arg4: memref<2x3xf32, #tpu.memory_space<vmem>>) attributes {dimension_semantics = [#tpu.dimension_semantics<parallel>], iteration_bounds = array<i64: 1>, scalar_prefetch = 0 : i64, scratch_operands = 0 : i64, tpu.core_type = #tpu.core_type<tc>, window_params = [{transform_indices = @transform_0, window_bounds = array<i64: 2, 160>}, {pipeline_mode = #tpu.pipeline_mode<synchronous>, transform_indices = @transform_1, window_bounds = array<i64: 160, 3>}, {pipeline_mode = #tpu.pipeline_mode<synchronous>, transform_indices = @transform_2, window_bounds = array<i64: 1, 3>}, {transform_indices = @transform_3, window_bounds = array<i64: 2, 3>}]} {
    %c0 = arith.constant 0 : index
    %c0_0 = arith.constant 0 : index
    %0 = vector.load %arg1[%c0, %c0_0] : memref<2x160xf32, #tpu.memory_space<vmem>>, vector<2x160xf32>
    %c0_1 = arith.constant 0 : index
    %c0_2 = arith.constant 0 : index
    %1 = vector.load %arg2[%c0_1, %c0_2] : memref<160x3xf32, #tpu.memory_space<vmem>>, vector<160x3xf32>
    %cst = arith.constant dense<0.000000e+00> : vector<2x3xf32>
    %2 = tpu.matmul %0, %1, %cst {dimension_numbers = #tpu.dot_dimension_numbers<[1], [0], [0], [1], [0, 0, 1, 1], [], []>} : vector<2x160xf32>, vector<160x3xf32>, vector<2x3xf32> -> vector<2x3xf32>
    %c0_3 = arith.constant 0 : index
    %c0_4 = arith.constant 0 : index
    %3 = vector.load %arg3[%c0_3, %c0_4] : memref<1x3xf32, #tpu.memory_space<vmem>>, vector<1x3xf32>
    %4 = vector.broadcast %3 : vector<1x3xf32> to vector<2x3xf32>
    %5 = arith.addf %2, %4 : vector<2x3xf32>
    %c0_5 = arith.constant 0 : index
    %c0_6 = arith.constant 0 : index
    %6 = vector.load %arg4[%c0_5, %c0_6] : memref<2x3xf32, #tpu.memory_space<vmem>>, vector<2x3xf32>
    tpu.vector_store %arg4[%c0_5, %c0_6], %5 {strides = array<i32>} : memref<2x3xf32, #tpu.memory_space<vmem>>, vector<2x3xf32>,
    return
  }
  func.func @transform_0(%arg0: i32) -> (i32, i32) {
    %c0_i32 = arith.constant 0 : i32
    %c0_i32_0 = arith.constant 0 : i32
    return %arg0, %c0_i32 : i32, i32
  }
  func.func @transform_1(%arg0: i32) -> (i32, i32) {
    %c0_i32 = arith.constant 0 : i32
    %c0_i32_0 = arith.constant 0 : i32
    %c0_i32_1 = arith.constant 0 : i32
    return %c0_i32, %c0_i32_0 : i32, i32
  }
  func.func @transform_2(%arg0: i32) -> (i32, i32) {
    %c0_i32 = arith.constant 0 : i32
    %c0_i32_0 = arith.constant 0 : i32
    %c0_i32_1 = arith.constant 0 : i32
    return %c0_i32, %c0_i32_0 : i32, i32
  }
  func.func @transform_3(%arg0: i32) -> (i32, i32) {
    %c0_i32 = arith.constant 0 : i32
    %c0_i32_0 = arith.constant 0 : i32
    return %arg0, %c0_i32 : i32, i32
  }
}

</mosaic_0001>

<bundles_post_ra>
// kernel: tpu_custom_call.1
= control target key start
LH: loop header
LB: loop body
LE: loop exit
PB: predicated region body
PF: predicated region fallthrough
CT: control target
= control target key end

     0   :  { %v201_v3 = vmov 0.0|0.0   ;;  %vm53_vm0 = vcmask 261120   ;;  %s301_s0 = inlined_call_operand.vmem [shape: f32[2,160], index: 0, kind: input, shape index: {}]   ;;  %s302_s1 = inlined_call_operand.vmem [shape: f32[160,3], index: 1, kind: input, shape index: {}]   ;;  %s303_s2 = inlined_call_operand.vmem [shape: f32[1,3], index: 2, kind: input, shape index: {}]   ;;  %s304_s3 = inlined_call_operand.hbm [shape: f32[2,3], index: 3, kind: output, shape index: {}]  }
   0x1   :  { %v16_v0 = vld [vmem:[%s302_s1] sm:$0xff]  ;;  %v17_v1 = vld [vmem:[%s302_s1 + $0x8] sm:$0xff]  ;;  %v18_v2 = vld [vmem:[%s302_s1 + $0x10] sm:$0xff]  ;;  %145 = vmatprep.subr.bf16.mxu0 %v201_v3 }
   0x2   :  { %v146_v4 = vpack.c.bf16 %v17_v1, %v16_v0  ;;  %v19_v5 = vld [vmem:[%s302_s1 + $0x18] sm:$0xff]  ;;  %v20_v7 = vld [vmem:[%s302_s1 + $0x20] sm:$0xff]  ;;  %v21_v8 = vld [vmem:[%s302_s1 + $0x28] sm:$0xff] }
   0x3   :  { %v149_v6 = vpack.c.bf16 %v19_v5, %v18_v2  ;;  %v143_v9 = vld.sshfl [vmem:[%s301_s0] sm:$0x33 pattern:$0x76325410]  ;;  %v152_v10 = vpack.c.bf16 %v21_v8, %v20_v7 }
   0x4   :  { %147 = vmatpush1.bf16.msra.mxu0 %v146_v4  ;;  %v51_v11 = vcombine.high %v143_v9, %v143_v9 }
   0x5   :  { %148 = vmatprep.subr.bf16.mxu0 %v201_v3 }
   0x8   :  { %150 = vmatpush1.bf16.msra.mxu0 %v149_v6 }
   0x9   :  { %8 = vsyncpa [#allocation3], 0  ;;  %151 = vmatprep.subr.bf16.mxu0 %v201_v3  ;;  %v22_v12 = vld [vmem:[%s302_s1 + $0x30] sm:$0xff]  ;;  %v23_v13 = vld [vmem:[%s302_s1 + $0x38] sm:$0xff]  ;;  %144 = vmatprep.mubr.msk.f32.mxu0 %vm53_vm0, %v51_v11  ;;  %s202_s28 = smov [#allocation2]   ;;  %vm126_vm1 = vcmask 17408  }
   0xa   :  { %v155_v14 = vpack.c.bf16 %v23_v13, %v22_v12  ;;  %v24_v15 = vld [vmem:[%s302_s1 + $0x40] sm:$0xff]  ;;  %v25_v16 = vld [vmem:[%s302_s1 + $0x48] sm:$0xff]  ;;  %v26_v18 = vld [vmem:[%s302_s1 + $0x50] sm:$0xff]  ;;  %s134_s29 = sshll.u32 %s202_s28, 4  ;;  %s135_s29 = int_to_ptr.vmem [resolvable:$true] %s134_s29 }
   0xb   :  { %v158_v17 = vpack.c.bf16 %v25_v16, %v24_v15  ;;  %v27_v19 = vld [vmem:[%s302_s1 + $0x58] sm:$0xff]  ;;  %v28_v21 = vld [vmem:[%s302_s1 + $0x60] sm:$0xff]  ;;  %v29_v22 = vld [vmem:[%s302_s1 + $0x68] sm:$0xff]  ;;  %s177_s30 = scalar_lea.vmem %s135_s29, 32  ;;  %p182_p1 = scmp.lt.s32.totalorder %s135_s29, %s135_s29 }
   0xc   :  { %153 = vmatpush1.bf16.msra.mxu0 %v152_v10  ;;  %v161_v20 = vpack.c.bf16 %v27_v19, %v26_v18  ;;  %v164_v23 = vpack.c.bf16 %v29_v22, %v28_v21  ;;  %v30_v24 = vld [vmem:[%s302_s1 + $0x70] sm:$0xff]  ;;  %v31_v25 = vld [vmem:[%s302_s1 + $0x78] sm:$0xff]  ;;  %v32_v27 = vld [vmem:[%s302_s1 + $0x80] sm:$0xff]  ;;  %p178_p0 = scmp.ne.s32.totalorder %s135_s29, %s177_s30  ;;  %p183_p2 = scmp.lt.s32.totalorder %s177_s30, %s177_s30 }
   0xd   :  { %154 = vmatprep.subr.bf16.mxu0 %v201_v3  ;;  %v167_v26 = vpack.c.bf16 %v31_v25, %v30_v24  ;;  %v33_v28 = vld [vmem:[%s302_s1 + $0x88] sm:$0xff]  ;;  %v34_v30 = vld [vmem:[%s302_s1 + $0x90] sm:$0xff]  ;;  %v35_v31 = vld [vmem:[%s302_s1 + $0x98] sm:$0xff] }
   0xe   :  { %v170_v29 = vpack.c.bf16 %v33_v28, %v32_v27  ;;  %v173_v32 = vpack.c.bf16 %v35_v31, %v34_v30  ;;  %v142_v33 = vld [vmem:[%s303_s2] ss:$0 sm:$0xff]  ;;  %p184_p3 = por %p183_p2, %p182_p1 }
  0x10   :  { %156 = vmatpush1.bf16.msra.mxu0 %v155_v14  ;;  %p185_p4 = pnand %p184_p3, %p178_p0 }
  0x11   :  { %157 = vmatprep.subr.bf16.mxu0 %v201_v3 }
  0x14   :  { %159 = vmatpush1.bf16.msra.mxu0 %v158_v17 }
  0x15   :  { %160 = vmatprep.subr.bf16.mxu0 %v201_v3 }
  0x18   :  { %162 = vmatpush1.bf16.msra.mxu0 %v161_v20 }
  0x19   :  { %163 = vmatprep.subr.bf16.mxu0 %v201_v3 }
  0x1c   :  { %165 = vmatpush1.bf16.msra.mxu0 %v164_v23 }
  0x1d   :  { %166 = vmatprep.subr.bf16.mxu0 %v201_v3 }
  0x20   :  { %168 = vmatpush1.bf16.msra.mxu0 %v167_v26 }
  0x21   :  { %169 = vmatprep.subr.bf16.mxu0 %v201_v3 }
  0x24   :  { %171 = vmatpush1.bf16.msra.mxu0 %v170_v29 }
  0x25   :  { %172 = vmatprep.subr.bf16.mxu0 %v201_v3 }
  0x28   :  { %174 = vmatpush1.bf16.msra.mxu0 %v173_v32 }
  0x2b   :  { %121 = vmatmul.mubr.f32.vlgmr.msra.gmra.mrb[0].mxu0 %v143_v9 }
  0xfe   :  { %v122_v34 = vpop.f32.mrb[0].mxu0 }
  0xff   :  { %v123_v35 = vadd.f32 %v142_v33, %v122_v34  ;;  %v124_v36 = vpop.f32.mrb[1].mxu0 }
 0x101   :  { %127 = vst.msk [vmem:[#allocation2] sm:$0x3] %vm126_vm1, %v123_v35 }
 0x102   :  { %188 = shalt.err (!%p185_p4)
}
 0x103   :  { %s189_s4 = scalar_lea.hbm %s304_s3, 32 }
 0x104   :  { %p190_p5 = scmp.ne.s32.totalorder %s304_s3, %s189_s4  ;;  %p193_p6 = scmp.lt.u32.totalorder %s189_s4, %s304_s3 }
 0x106   :  { %p195_p7 = pnand %p193_p6, %p190_p5 }
 0x108   :  { %198 = shalt.err (!%p195_p7)
}
 0x109   :  { %137 = dma.vmem_to_hbm [thread:$0]  %s135_s29, 32, %s304_s3, [#allocation3]  }
 0x10a   :  { %199 = dma.done.wait [#allocation3], 32  }
 0x10b   :  { %200 = vsyncadd [#allocation3], 4294967264 }
 0x10c   :  { %141 = vsyncpa [#allocation3], 1 }

</bundles_post_ra>
